<compile_context>
chip_gen: v7x
topology: tpu7x:2x2x1
jax: 0.10.0
libtpu: 0.0.40
codegen_flags: <defaults>
</compile_context>

<pallas_src>
import functools

import jax
import jax.numpy as jnp
from jax.experimental import pallas as pl
from jax.experimental.pallas import tpu as pltpu

IN_DIM = 1600                      # fixed by the module (SVD-reduced node count)
LANE = 128
SUBLANE = 8


def _round_up(a, m):
    return ((a + m - 1) // m) * m


F_PAD = _round_up(IN_DIM, LANE)    # 1664 = 13 * 128


def _leaky_relu(x, slope=0.2):
    return jnp.where(x > 0, x, slope * x)


def fc_kernel(x_ref, w1_ref, b1_ref, w2_ref, b2_ref, enc_ref, dec_ref):
    # Encoder: bf16 matmul on the MXU, f32 accumulation, f32 elementwise.
    x = x_ref[...]                                               # (TB, F_PAD) bf16
    h = jnp.dot(x, w1_ref[...], preferred_element_type=jnp.float32)
    enc = _leaky_relu(h + b1_ref[...])                           # f32
    enc_ref[...] = enc.astype(enc_ref.dtype)

    # Decoder: cast activation to bf16 only for the matmul operand.
    d = jnp.dot(enc.astype(w2_ref.dtype), w2_ref[...],
                preferred_element_type=jnp.float32)
    dec_ref[...] = _leaky_relu(d + b2_ref[...]).astype(dec_ref.dtype)


@functools.partial(jax.jit, static_argnames=("block_batch",))
def fc_forward(x, w1, b1, w2, b2, *, block_batch=256):
    """FC forward pass.

    x:  (B, 1600) float
    w1: (1600, H)  (transpose of PyTorch's (H, 1600))
    b1: (H,) or (1, H)
    w2: (H, 1600)  (transpose of PyTorch's (1600, H))
    b2: (1600,) or (1, 1600)
    Returns (encoded (B, H) f32, decoded (B, 1600) f32).
    """
    B = x.shape[0]
    H = w1.shape[1]
    h_pad = _round_up(max(H, LANE), LANE)

    # ---- batch tiling -------------------------------------------------------
    if B >= block_batch:
        tb = block_batch
    else:
        tb = _round_up(B, SUBLANE)
    b_pad = _round_up(B, tb)
    n_blocks = b_pad // tb

    # ---- pad operands to lane/sublane-friendly shapes, cast to bf16 --------
    b1 = jnp.asarray(b1).reshape(1, -1).astype(jnp.float32)
    b2 = jnp.asarray(b2).reshape(1, -1).astype(jnp.float32)

    x_p = jnp.pad(x.astype(jnp.float32),
                  ((0, b_pad - B), (0, F_PAD - IN_DIM))).astype(jnp.bfloat16)
    w1_p = jnp.pad(w1.astype(jnp.float32),
                   ((0, F_PAD - IN_DIM), (0, h_pad - H))).astype(jnp.bfloat16)
    b1_p = jnp.pad(b1, ((0, 0), (0, h_pad - H)))
    w2_p = jnp.pad(w2.astype(jnp.float32),
                   ((0, h_pad - H), (0, F_PAD - IN_DIM))).astype(jnp.bfloat16)
    b2_p = jnp.pad(b2, ((0, 0), (0, F_PAD - IN_DIM)))

    # ---- VMEM budget + cost estimate ---------------------------------------
    vmem_bytes = int(
        2 * (tb * F_PAD * 2          # double-buffered x tile (bf16)
             + tb * h_pad * 4        # encoded tile (f32)
             + tb * F_PAD * 4)       # decoded tile (f32)
        + F_PAD * h_pad * 2 * 2      # W1 + W2 resident (bf16)
        + (h_pad + F_PAD) * 4        # biases (f32)
    ) + (4 << 20)                    # slack
    vmem_bytes = min(max(vmem_bytes, 16 << 20), 48 << 20)

    cost = pl.CostEstimate(
        flops=2 * 2 * b_pad * F_PAD * h_pad,
        transcendentals=0,
        bytes_accessed=int(x_p.size * 2 + w1_p.size * 2 + w2_p.size * 2
                           + b1_p.size * 4 + b2_p.size * 4
                           + b_pad * h_pad * 4 + b_pad * F_PAD * 4),
    )

    # ---- pallas call --------------------------------------------------------
    enc_p, dec_p = pl.pallas_call(
        fc_kernel,
        out_shape=(
            jax.ShapeDtypeStruct((b_pad, h_pad), jnp.float32),   # encoded (padded)
            jax.ShapeDtypeStruct((b_pad, F_PAD), jnp.float32),   # decoded (padded)
        ),
        grid_spec=pltpu.PrefetchScalarGridSpec(
            num_scalar_prefetch=0,
            grid=(n_blocks,),
            in_specs=[
                pl.BlockSpec((tb, F_PAD), lambda i: (i, 0)),     # x tile
                pl.BlockSpec((F_PAD, h_pad), lambda i: (0, 0)),  # W1 resident
                pl.BlockSpec((1, h_pad), lambda i: (0, 0)),      # b1 resident
                pl.BlockSpec((h_pad, F_PAD), lambda i: (0, 0)),  # W2 resident
                pl.BlockSpec((1, F_PAD), lambda i: (0, 0)),      # b2 resident
            ],
            out_specs=(
                pl.BlockSpec((tb, h_pad), lambda i: (i, 0)),
                pl.BlockSpec((tb, F_PAD), lambda i: (i, 0)),
            ),
        ),
        compiler_params=pltpu.CompilerParams(
            dimension_semantics=("parallel",),
            vmem_limit_bytes=vmem_bytes,
        ),
        cost_estimate=cost,
    )(x_p, w1_p, b1_p, w2_p, b2_p)

    # Slice padded outputs back to logical shapes.
    return enc_p[:B, :H], dec_p[:B, :IN_DIM]


def init_fc_params(key, hidden_1):
    """Deterministic init mimicking nn.Linear default (uniform +/- 1/sqrt(fan_in))."""
    k1, k2, k3, k4 = jax.random.split(key, 4)
    bound1 = 1.0 / jnp.sqrt(jnp.float32(IN_DIM))
    bound2 = 1.0 / jnp.sqrt(jnp.float32(hidden_1))
    # Stored as (in_features, out_features) — transpose of PyTorch's (out, in).
    w1 = jax.random.uniform(k1, (IN_DIM, hidden_1), jnp.float32, -bound1, bound1)
    b1 = jax.random.uniform(k2, (1, hidden_1), jnp.float32, -bound1, bound1)
    w2 = jax.random.uniform(k3, (hidden_1, IN_DIM), jnp.float32, -bound2, bound2)
    b2 = jax.random.uniform(k4, (1, IN_DIM), jnp.float32, -bound2, bound2)
    return w1, b1, w2, b2


def reference_forward_f32(x, w1, b1, w2, b2):
    enc = _leaky_relu(x @ w1 + b1)
    dec = _leaky_relu(enc @ w2 + b2)
    return enc, dec


def reference_forward_bf16(x, w1, b1, w2, b2):
    """Reference with the same bf16 matmul-operand quantization as the kernel."""
    xb = x.astype(jnp.bfloat16)
    enc = _leaky_relu(
        jnp.dot(xb, w1.astype(jnp.bfloat16), preferred_element_type=jnp.float32) + b1)
    dec = _leaky_relu(
        jnp.dot(enc.astype(jnp.bfloat16), w2.astype(jnp.bfloat16),
                preferred_element_type=jnp.float32) + b2)
    return enc, dec


if __name__ == "__main__":
    key = jax.random.PRNGKey(0)
    kx, kp = jax.random.split(key)

    batch = 8
    hidden_1 = 32

    x = jax.random.normal(kx, (batch, IN_DIM), jnp.float32)
    w1, b1, w2, b2 = init_fc_params(kp, hidden_1)

    encoded, decoded = fc_forward(x, w1, b1, w2, b2)
    jax.block_until_ready((encoded, decoded))

    assert encoded.shape == (batch, hidden_1)
    assert decoded.shape == (batch, IN_DIM)

    # Tight check vs. a reference with matching bf16 matmul operands.
    enc_q, dec_q = reference_forward_bf16(x, w1, b1, w2, b2)
    assert jnp.allclose(encoded, enc_q, atol=5e-3, rtol=5e-3)
    assert jnp.allclose(decoded, dec_q, atol=5e-3, rtol=5e-3)

    # Loose check vs. the pure-f32 reference (bf16 operand quantization only).
    enc_f, dec_f = reference_forward_f32(x, w1, b1, w2, b2)
    assert jnp.allclose(encoded, enc_f, atol=5e-2, rtol=5e-2)
    assert jnp.allclose(decoded, dec_f, atol=5e-2, rtol=5e-2)

    print("KERNEL_OK")
</pallas_src>

<mosaic_0001>
module attributes {stable_mosaic.version = 11 : i64} {
  func.func @fc_kernel(%arg0: i32, %arg1: memref<8x1664xbf16, #tpu.memory_space<vmem>>, %arg2: memref<1664x128xbf16, #tpu.memory_space<vmem>>, %arg3: memref<1x128xf32, #tpu.memory_space<vmem>>, %arg4: memref<128x1664xbf16, #tpu.memory_space<vmem>>, %arg5: memref<1x1664xf32, #tpu.memory_space<vmem>>, %arg6: memref<8x128xf32, #tpu.memory_space<vmem>>, %arg7: memref<8x1664xf32, #tpu.memory_space<vmem>>) attributes {dimension_semantics = [#tpu.dimension_semantics<parallel>], iteration_bounds = array<i64: 1>, scalar_prefetch = 0 : i64, scratch_operands = 0 : i64, tpu.core_type = #tpu.core_type<tc>, window_params = [{transform_indices = @transform_0, window_bounds = array<i64: 8, 1664>}, {pipeline_mode = #tpu.pipeline_mode<synchronous>, transform_indices = @transform_1, window_bounds = array<i64: 1664, 128>}, {pipeline_mode = #tpu.pipeline_mode<synchronous>, transform_indices = @transform_2, window_bounds = array<i64: 1, 128>}, {pipeline_mode = #tpu.pipeline_mode<synchronous>, transform_indices = @transform_3, window_bounds = array<i64: 128, 1664>}, {pipeline_mode = #tpu.pipeline_mode<synchronous>, transform_indices = @transform_4, window_bounds = array<i64: 1, 1664>}, {transform_indices = @transform_5, window_bounds = array<i64: 8, 128>}, {transform_indices = @transform_6, window_bounds = array<i64: 8, 1664>}]} {
    %c0 = arith.constant 0 : index
    %c0_0 = arith.constant 0 : index
    %0 = vector.load %arg1[%c0, %c0_0] : memref<8x1664xbf16, #tpu.memory_space<vmem>>, vector<8x1664xbf16>
    %c0_1 = arith.constant 0 : index
    %c0_2 = arith.constant 0 : index
    %1 = vector.load %arg2[%c0_1, %c0_2] : memref<1664x128xbf16, #tpu.memory_space<vmem>>, vector<1664x128xbf16>
    %cst = arith.constant dense<0.000000e+00> : vector<8x128xf32>
    %2 = tpu.matmul %0, %1, %cst {dimension_numbers = #tpu.dot_dimension_numbers<[1], [0], [0], [1], [0, 0, 1, 1], [], []>} : vector<8x1664xbf16>, vector<1664x128xbf16>, vector<8x128xf32> -> vector<8x128xf32>
    %c0_3 = arith.constant 0 : index
    %c0_4 = arith.constant 0 : index
    %3 = vector.load %arg3[%c0_3, %c0_4] : memref<1x128xf32, #tpu.memory_space<vmem>>, vector<1x128xf32>
    %4 = vector.broadcast %3 : vector<1x128xf32> to vector<8x128xf32>
    %5 = arith.addf %2, %4 : vector<8x128xf32>
    %cst_5 = arith.constant 0.000000e+00 : f32
    %6 = vector.broadcast %cst_5 : f32 to vector<8x128xf32>
    %7 = arith.cmpf ogt, %5, %6 : vector<8x128xf32>
    %cst_6 = arith.constant 2.000000e-01 : f32
    %8 = vector.broadcast %cst_6 : f32 to vector<8x128xf32>
    %9 = arith.mulf %8, %5 : vector<8x128xf32>
    %10 = arith.select %7, %5, %9 : vector<8x128xi1>, vector<8x128xf32>
    %c0_7 = arith.constant 0 : index
    %c0_8 = arith.constant 0 : index
    %11 = vector.load %arg6[%c0_7, %c0_8] : memref<8x128xf32, #tpu.memory_space<vmem>>, vector<8x128xf32>
    tpu.vector_store %arg6[%c0_7, %c0_8], %10 {strides = array<i32>} : memref<8x128xf32, #tpu.memory_space<vmem>>, vector<8x128xf32>,
    %12 = arith.truncf %10 : vector<8x128xf32> to vector<8x128xbf16>
    %c0_9 = arith.constant 0 : index
    %c0_10 = arith.constant 0 : index
    %13 = vector.load %arg4[%c0_9, %c0_10] : memref<128x1664xbf16, #tpu.memory_space<vmem>>, vector<128x1664xbf16>
    %cst_11 = arith.constant dense<0.000000e+00> : vector<8x1664xf32>
    %14 = tpu.matmul %12, %13, %cst_11 {dimension_numbers = #tpu.dot_dimension_numbers<[1], [0], [0], [1], [0, 0, 1, 1], [], []>} : vector<8x128xbf16>, vector<128x1664xbf16>, vector<8x1664xf32> -> vector<8x1664xf32>
    %c0_12 = arith.constant 0 : index
    %c0_13 = arith.constant 0 : index
    %15 = vector.load %arg5[%c0_12, %c0_13] : memref<1x1664xf32, #tpu.memory_space<vmem>>, vector<1x1664xf32>
    %16 = vector.broadcast %15 : vector<1x1664xf32> to vector<8x1664xf32>
    %17 = arith.addf %14, %16 : vector<8x1664xf32>
    %cst_14 = arith.constant 0.000000e+00 : f32
    %18 = vector.broadcast %cst_14 : f32 to vector<8x1664xf32>
    %19 = arith.cmpf ogt, %17, %18 : vector<8x1664xf32>
    %cst_15 = arith.constant 2.000000e-01 : f32
    %20 = vector.broadcast %cst_15 : f32 to vector<8x1664xf32>
    %21 = arith.mulf %20, %17 : vector<8x1664xf32>
    %22 = arith.select %19, %17, %21 : vector<8x1664xi1>, vector<8x1664xf32>
    %c0_16 = arith.constant 0 : index
    %c0_17 = arith.constant 0 : index
    %23 = vector.load %arg7[%c0_16, %c0_17] : memref<8x1664xf32, #tpu.memory_space<vmem>>, vector<8x1664xf32>
    tpu.vector_store %arg7[%c0_16, %c0_17], %22 {strides = array<i32>} : memref<8x1664xf32, #tpu.memory_space<vmem>>, vector<8x1664xf32>,
    return
  }
  func.func @transform_0(%arg0: i32) -> (i32, i32) {
    %c0_i32 = arith.constant 0 : i32
    %c0_i32_0 = arith.constant 0 : i32
    return %arg0, %c0_i32 : i32, i32
  }
  func.func @transform_1(%arg0: i32) -> (i32, i32) {
    %c0_i32 = arith.constant 0 : i32
    %c0_i32_0 = arith.constant 0 : i32
    %c0_i32_1 = arith.constant 0 : i32
    return %c0_i32, %c0_i32_0 : i32, i32
  }
  func.func @transform_2(%arg0: i32) -> (i32, i32) {
    %c0_i32 = arith.constant 0 : i32
    %c0_i32_0 = arith.constant 0 : i32
    %c0_i32_1 = arith.constant 0 : i32
    return %c0_i32, %c0_i32_0 : i32, i32
  }
  func.func @transform_3(%arg0: i32) -> (i32, i32) {
    %c0_i32 = arith.constant 0 : i32
    %c0_i32_0 = arith.constant 0 : i32
    %c0_i32_1 = arith.constant 0 : i32
    return %c0_i32, %c0_i32_0 : i32, i32
  }
  func.func @transform_4(%arg0: i32) -> (i32, i32) {
    %c0_i32 = arith.constant 0 : i32
    %c0_i32_0 = arith.constant 0 : i32
    %c0_i32_1 = arith.constant 0 : i32
    return %c0_i32, %c0_i32_0 : i32, i32
  }
  func.func @transform_5(%arg0: i32) -> (i32, i32) {
    %c0_i32 = arith.constant 0 : i32
    %c0_i32_0 = arith.constant 0 : i32
    return %arg0, %c0_i32 : i32, i32
  }
  func.func @transform_6(%arg0: i32) -> (i32, i32) {
    %c0_i32 = arith.constant 0 : i32
    %c0_i32_0 = arith.constant 0 : i32
    return %arg0, %c0_i32 : i32, i32
  }
}

</mosaic_0001>

<bundles_post_ra>
// kernel: fc_forward.1
= control target key start
LH: loop header
LB: loop body
LE: loop exit
PB: predicated region body
PF: predicated region fallthrough
CT: control target
= control target key end

     0   :  { %12 = vsyncpa [#allocation3], 0  ;;  %vm3012_vm0 = vmmov 0   ;;  %s3794_s0 = inlined_call_operand.vmem [shape: bf16[8,1664], index: 0, kind: input, shape index: {}]   ;;  %s3795_s1 = inlined_call_operand.vmem [shape: bf16[1664,128], index: 1, kind: input, shape index: {}]   ;;  %s3796_s2 = inlined_call_operand.vmem [shape: f32[1,128], index: 2, kind: input, shape index: {}]   ;;  %s3797_s3 = inlined_call_operand.vmem [shape: bf16[128,1664], index: 3, kind: input, shape index: {}]   ;;  %s3798_s4 = inlined_call_operand.vmem [shape: f32[1,1664], index: 4, kind: input, shape index: {}]   ;;  %s3799_s5 = inlined_call_operand.hbm [shape: f32[8,128], index: 5, kind: output, shape index: {0}]   ;;  %s3800_s6 = inlined_call_operand.hbm [shape: f32[8,1664], index: 6, kind: output, shape index: {1}]  }
   0x1   :  { %v2694_v0 = vld [vmem:[%s3795_s1 + $0x40] sm:$0xff]   ;;  %v2698_v4 = vld [vmem:[%s3795_s1 + $0x48] sm:$0xff]   ;;  %v2702_v8 = vld [vmem:[%s3795_s1 + $0x50] sm:$0xff]  }
   0x2   :  { %v2695_v1 = vld [vmem:[%s3795_s1] sm:$0xff]   ;;  %2499 = vmatprep.subr.bf16.mxu0 %v2694_v0  ;;  %v2699_v5 = vld [vmem:[%s3795_s1 + $0x8] sm:$0xff]   ;;  %v2703_v9 = vld [vmem:[%s3795_s1 + $0x10] sm:$0xff]  }
   0x3   :  { %v2696_v2 = vld [vmem:[%s3795_s1 + $0xc0] sm:$0xff]   ;;  %2500 = vmatpush3.bf16.msra.mxu0 %v2695_v1  ;;  %v2700_v6 = vld [vmem:[%s3795_s1 + $0xc8] sm:$0xff]   ;;  %v2704_v10 = vld [vmem:[%s3795_s1 + $0xd0] sm:$0xff]  }
   0x4   :  { %v2697_v3 = vld [vmem:[%s3795_s1 + $0x80] sm:$0xff]   ;;  %2521 = vmatprep.subr.bf16.mxu1 %v2696_v2  ;;  %2501 = vmatprep.subr.bf16.mxu0 %v2698_v4  ;;  %v2701_v7 = vld [vmem:[%s3795_s1 + $0x88] sm:$0xff]   ;;  %v2705_v11 = vld [vmem:[%s3795_s1 + $0x90] sm:$0xff]  }
   0x5   :  { %2522 = vmatpush3.bf16.msra.mxu1 %v2697_v3  ;;  %v2706_v12 = vld [vmem:[%s3795_s1 + $0x58] sm:$0xff]   ;;  %v2710_v16 = vld [vmem:[%s3795_s1 + $0x60] sm:$0xff]   ;;  %v2714_v20 = vld [vmem:[%s3795_s1 + $0x68] sm:$0xff]  }
   0x6   :  { %2523 = vmatprep.subr.bf16.mxu1 %v2700_v6  ;;  %v2707_v13 = vld [vmem:[%s3795_s1 + $0x18] sm:$0xff]   ;;  %v2711_v17 = vld [vmem:[%s3795_s1 + $0x20] sm:$0xff]   ;;  %v2715_v21 = vld [vmem:[%s3795_s1 + $0x28] sm:$0xff]  }
   0x7   :  { %2502 = vmatpush3.bf16.msra.mxu0 %v2699_v5  ;;  %v2708_v14 = vld [vmem:[%s3795_s1 + $0xd8] sm:$0xff]   ;;  %v2712_v18 = vld [vmem:[%s3795_s1 + $0xe0] sm:$0xff]   ;;  %v2716_v22 = vld [vmem:[%s3795_s1 + $0xe8] sm:$0xff]  }
   0x8   :  { %2503 = vmatprep.subr.bf16.mxu0 %v2702_v8  ;;  %v2709_v15 = vld [vmem:[%s3795_s1 + $0x98] sm:$0xff]   ;;  %v2713_v19 = vld [vmem:[%s3795_s1 + $0xa0] sm:$0xff]   ;;  %v2717_v23 = vld [vmem:[%s3795_s1 + $0xa8] sm:$0xff]  }
   0x9   :  { %2524 = vmatpush3.bf16.msra.mxu1 %v2701_v7  ;;  %v2718_v24 = vld [vmem:[%s3795_s1 + $0x70] sm:$0xff]   ;;  %v2722_v28 = vld [vmem:[%s3795_s1 + $0x78] sm:$0xff]   ;;  %v25_v31 = vld [vmem:[%s3794_s0] sm:$0xff] }
   0xa   :  { %2525 = vmatprep.subr.bf16.mxu1 %v2704_v10  ;;  %v2719_v25 = vld [vmem:[%s3795_s1 + $0x30] sm:$0xff]   ;;  %v2723_v29 = vld [vmem:[%s3795_s1 + $0x38] sm:$0xff]   ;;  %v2278_v32 = vcombine.low %v25_v31, %v25_v31  ;;  %v2279_v33 = vcombine.high %v25_v31, %v25_v31  ;;  %v2728_v35 = vld [vmem:[%s3795_s1 + $0x140] sm:$0xff]  }
   0xb   :  { %2504 = vmatpush3.bf16.msra.mxu0 %v2703_v9  ;;  %v2720_v26 = vld [vmem:[%s3795_s1 + $0xf0] sm:$0xff]   ;;  %v2724_v30 = vld [vmem:[%s3795_s1 + $0xf8] sm:$0xff]   ;;  %v26_v36 = vld [vmem:[%s3794_s0 + $0x8] sm:$0xff] }
   0xc   :  { %2505 = vmatprep.subr.bf16.mxu0 %v2706_v12  ;;  %v2721_v27 = vld [vmem:[%s3795_s1 + $0xb0] sm:$0xff]   ;;  %v2727_v34 = vld [vmem:[%s3795_s1 + $0xb8] sm:$0xff]   ;;  %949 = vmatprep.mubr.bf16.mxu0 %v2279_v33  ;;  %v2280_v37 = vcombine.low %v26_v36, %v26_v36  ;;  %v2281_v38 = vcombine.high %v26_v36, %v26_v36  ;;  %v2731_v39 = vld [vmem:[%s3795_s1 + $0x100] sm:$0xff]  }
   0xd   :  { %2526 = vmatpush3.bf16.msra.mxu1 %v2705_v11  ;;  %v2732_v40 = vld [vmem:[%s3795_s1 + $0x1c0] sm:$0xff]   ;;  %v2734_v42 = vld [vmem:[%s3795_s1 + $0x148] sm:$0xff]   ;;  %v2738_v46 = vld [vmem:[%s3795_s1 + $0x150] sm:$0xff]  }
   0xe   :  { %2527 = vmatprep.subr.bf16.mxu1 %v2708_v14  ;;  %989 = vmatprep.mubr.bf16.mxu1 %v2281_v38  ;;  %v2733_v41 = vld [vmem:[%s3795_s1 + $0x180] sm:$0xff]   ;;  %v2735_v43 = vld [vmem:[%s3795_s1 + $0x108] sm:$0xff]   ;;  %v2739_v47 = vld [vmem:[%s3795_s1 + $0x110] sm:$0xff]  }
   0xf   :  { %2506 = vmatpush3.bf16.msra.mxu0 %v2707_v13  ;;  %v2736_v44 = vld [vmem:[%s3795_s1 + $0x1c8] sm:$0xff]   ;;  %v2740_v48 = vld [vmem:[%s3795_s1 + $0x1d0] sm:$0xff]   ;;  %v2742_v50 = vld [vmem:[%s3795_s1 + $0x158] sm:$0xff]  }
  0x10   :  { %2507 = vmatprep.subr.bf16.mxu0 %v2710_v16  ;;  %v2737_v45 = vld [vmem:[%s3795_s1 + $0x188] sm:$0xff]   ;;  %v2741_v49 = vld [vmem:[%s3795_s1 + $0x190] sm:$0xff]   ;;  %v2743_v51 = vld [vmem:[%s3795_s1 + $0x118] sm:$0xff]  }
  0x11   :  { %2528 = vmatpush3.bf16.msra.mxu1 %v2709_v15  ;;  %v2744_v52 = vld [vmem:[%s3795_s1 + $0x1d8] sm:$0xff]   ;;  %v2746_v54 = vld [vmem:[%s3795_s1 + $0x160] sm:$0xff]   ;;  %v2750_v58 = vld [vmem:[%s3795_s1 + $0x168] sm:$0xff]  }
  0x12   :  { %2529 = vmatprep.subr.bf16.mxu1 %v2712_v18  ;;  %v2745_v53 = vld [vmem:[%s3795_s1 + $0x198] sm:$0xff]   ;;  %v2747_v55 = vld [vmem:[%s3795_s1 + $0x120] sm:$0xff]   ;;  %v2751_v59 = vld [vmem:[%s3795_s1 + $0x128] sm:$0xff]  }
  0x13   :  { %2508 = vmatpush3.bf16.msra.mxu0 %v2711_v17  ;;  %v2748_v56 = vld [vmem:[%s3795_s1 + $0x1e0] sm:$0xff]   ;;  %v2752_v60 = vld [vmem:[%s3795_s1 + $0x1e8] sm:$0xff]   ;;  %v2754_v62 = vld [vmem:[%s3795_s1 + $0x170] sm:$0xff]  }
  0x14   :  { %2509 = vmatprep.subr.bf16.mxu0 %v2714_v20  ;;  %v2749_v57 = vld [vmem:[%s3795_s1 + $0x1a0] sm:$0xff]   ;;  %v2753_v61 = vld [vmem:[%s3795_s1 + $0x1a8] sm:$0xff]   ;;  %v2755_v63 = vld [vmem:[%s3795_s1 + $0x130] sm:$0xff]  }
  0x15   :  { %2530 = vmatpush3.bf16.msra.mxu1 %v2713_v19  ;;  %v2756_v0 = vld [vmem:[%s3795_s1 + $0x1f0] sm:$0xff]   ;;  %v2758_v2 = vld [vmem:[%s3795_s1 + $0x178] sm:$0xff]   ;;  %v2764_v9 = vld [vmem:[%s3795_s1 + $0x240] sm:$0xff]  }
  0x16   :  { %2531 = vmatprep.subr.bf16.mxu1 %v2716_v22  ;;  %v2757_v1 = vld [vmem:[%s3795_s1 + $0x1b0] sm:$0xff]   ;;  %v2759_v3 = vld [vmem:[%s3795_s1 + $0x138] sm:$0xff]   ;;  %v2767_v13 = vld [vmem:[%s3795_s1 + $0x200] sm:$0xff]  }
  0x17   :  { %2510 = vmatpush3.bf16.msra.mxu0 %v2715_v21  ;;  %v2760_v4 = vld [vmem:[%s3795_s1 + $0x1f8] sm:$0xff]   ;;  %v27_v5 = vld [vmem:[%s3794_s0 + $0x10] sm:$0xff]  ;;  %v2768_v14 = vld [vmem:[%s3795_s1 + $0x2c0] sm:$0xff]  }
  0x18   :  { %2511 = vmatprep.subr.bf16.mxu0 %v2718_v24  ;;  %v2282_v6 = vcombine.low %v27_v5, %v27_v5  ;;  %v2283_v7 = vcombine.high %v27_v5, %v27_v5  ;;  %v2763_v8 = vld [vmem:[%s3795_s1 + $0x1b8] sm:$0xff]   ;;  %v2769_v15 = vld [vmem:[%s3795_s1 + $0x280] sm:$0xff]   ;;  %v2770_v16 = vld [vmem:[%s3795_s1 + $0x248] sm:$0xff]  }
  0x19   :  { %2532 = vmatpush3.bf16.msra.mxu1 %v2717_v23  ;;  %v28_v10 = vld [vmem:[%s3794_s0 + $0x18] sm:$0xff]  ;;  %v2771_v17 = vld [vmem:[%s3795_s1 + $0x208] sm:$0xff]   ;;  %v2774_v20 = vld [vmem:[%s3795_s1 + $0x250] sm:$0xff]  }
  0x1a   :  { %2533 = vmatprep.subr.bf16.mxu1 %v2720_v26  ;;  %v2284_v11 = vcombine.low %v28_v10, %v28_v10  ;;  %v2285_v12 = vcombine.high %v28_v10, %v28_v10  ;;  %v2772_v18 = vld [vmem:[%s3795_s1 + $0x2c8] sm:$0xff]   ;;  %v2775_v21 = vld [vmem:[%s3795_s1 + $0x210] sm:$0xff]   ;;  %v2778_v24 = vld [vmem:[%s3795_s1 + $0x258] sm:$0xff]  }
  0x1b   :  { %2512 = vmatpush3.bf16.msra.mxu0 %v2719_v25  ;;  %v2773_v19 = vld [vmem:[%s3795_s1 + $0x288] sm:$0xff]   ;;  %v2776_v22 = vld [vmem:[%s3795_s1 + $0x2d0] sm:$0xff]   ;;  %v2779_v25 = vld [vmem:[%s3795_s1 + $0x218] sm:$0xff]  }
  0x1c   :  { %2513 = vmatprep.subr.bf16.mxu0 %v2722_v28  ;;  %v2777_v23 = vld [vmem:[%s3795_s1 + $0x290] sm:$0xff]   ;;  %v2780_v26 = vld [vmem:[%s3795_s1 + $0x2d8] sm:$0xff]   ;;  %v2782_v28 = vld [vmem:[%s3795_s1 + $0x260] sm:$0xff]  }
  0x1d   :  { %2534 = vmatpush3.bf16.msra.mxu1 %v2721_v27  ;;  %v2781_v27 = vld [vmem:[%s3795_s1 + $0x298] sm:$0xff]   ;;  %v2785_v31 = vld [vmem:[%s3795_s1 + $0x2a0] sm:$0xff]   ;;  %v2787_v33 = vld [vmem:[%s3795_s1 + $0x228] sm:$0xff]  }
  0x1e   :  { %2535 = vmatprep.subr.bf16.mxu1 %v2724_v30  ;;  %v2784_v30 = vld [vmem:[%s3795_s1 + $0x2e0] sm:$0xff]   ;;  %v2790_v36 = vld [vmem:[%s3795_s1 + $0x270] sm:$0xff]  }
  0x1f   :  { %2514 = vmatpush3.bf16.msra.mxu0 %v2723_v29  ;;  %v2783_v29 = vld [vmem:[%s3795_s1 + $0x220] sm:$0xff]   ;;  %v2792_v38 = vld [vmem:[%s3795_s1 + $0x2f0] sm:$0xff]  }
  0x20   :  { %2543 = vmatprep.subr.bf16.mxu0 %v2728_v35  ;;  %v2789_v35 = vld [vmem:[%s3795_s1 + $0x2a8] sm:$0xff]  }
  0x21   :  { %2536 = vmatpush3.bf16.msra.mxu1 %v2727_v34  ;;  %v2788_v34 = vld [vmem:[%s3795_s1 + $0x2e8] sm:$0xff]  }
  0x22   :  { %950 = vmatmul.mubr.bf16.vlgmr.msra.gmra.mrb[0].mxu0 %v2278_v32  ;;  %2565 = vmatprep.subr.bf16.mxu1 %v2732_v40  ;;  %v2786_v32 = vld [vmem:[%s3795_s1 + $0x268] sm:$0xff]   ;;  %v2794_v40 = vld [vmem:[%s3795_s1 + $0x278] sm:$0xff]  }
  0x23   :  { %2544 = vmatpush3.bf16.msra.mxu0 %v2731_v39  ;;  %1029 = vmatprep.mubr.bf16.mxu0 %v2283_v7  ;;  %v2793_v39 = vld [vmem:[%s3795_s1 + $0x2b0] sm:$0xff]  }
  0x24   :  { %990 = vmatmul.mubr.bf16.vlgmr.msra.gmra.mrb[0].mxu1 %v2280_v37  ;;  %2545 = vmatprep.subr.bf16.mxu0 %v2734_v42  ;;  %v2791_v37 = vld [vmem:[%s3795_s1 + $0x230] sm:$0xff]   ;;  %v2796_v42 = vld [vmem:[%s3795_s1 + $0x2f8] sm:$0xff]  }
  0x25   :  { %2566 = vmatpush3.bf16.msra.mxu1 %v2733_v41  ;;  %1069 = vmatprep.mubr.bf16.mxu1 %v2285_v12  ;;  %v2795_v41 = vld [vmem:[%s3795_s1 + $0x238] sm:$0xff]  }
  0x26   :  { %2567 = vmatprep.subr.bf16.mxu1 %v2736_v44 }
  0x27   :  { %2546 = vmatpush3.bf16.msra.mxu0 %v2735_v43  ;;  %v29_v43 = vld [vmem:[%s3794_s0 + $0x20] sm:$0xff] }
  0x28   :  { %2547 = vmatprep.subr.bf16.mxu0 %v2738_v46  ;;  %v2286_v44 = vcombine.low %v29_v43, %v29_v43  ;;  %v2799_v46 = vld [vmem:[%s3795_s1 + $0x2b8] sm:$0xff]  }
  0x29   :  { %2568 = vmatpush3.bf16.msra.mxu1 %v2737_v45  ;;  %v2287_v45 = vcombine.high %v29_v43, %v29_v43 }
  0x2a   :  { %2569 = vmatprep.subr.bf16.mxu1 %v2740_v48  ;;  %v3011_v48 = vmov 0.0  }
  0x2b   :  { %2548 = vmatpush3.bf16.msra.mxu0 %v2739_v47  ;;  %v30_v47 = vld [vmem:[%s3794_s0 + $0x28] sm:$0xff] }
  0x2c   :  { %2549 = vmatprep.subr.bf16.mxu0 %v2742_v50  ;;  %v2289_v50 = vcombine.high %v30_v47, %v30_v47 }
  0x2d   :  { %2570 = vmatpush3.bf16.msra.mxu1 %v2741_v49  ;;  %v2288_v49 = vcombine.low %v30_v47, %v30_v47 }
  0x2e   :  { %2571 = vmatprep.subr.bf16.mxu1 %v2744_v52  ;;  %v2803_v52 = vld [vmem:[%s3795_s1 + $0x308] sm:$0xff]  }
  0x2f   :  { %2550 = vmatpush3.bf16.msra.mxu0 %v2743_v51  ;;  %v2802_v51 = vld [vmem:[%s3795_s1 + $0x300] sm:$0xff]  }
  0x30   :  { %2551 = vmatprep.subr.bf16.mxu0 %v2746_v54  ;;  %v2805_v54 = vld [vmem:[%s3795_s1 + $0x318] sm:$0xff]  }
  0x31   :  { %2572 = vmatpush3.bf16.msra.mxu1 %v2745_v53  ;;  %v2804_v53 = vld [vmem:[%s3795_s1 + $0x310] sm:$0xff]  }
  0x32   :  { %2573 = vmatprep.subr.bf16.mxu1 %v2748_v56  ;;  %v2807_v56 = vld [vmem:[%s3795_s1 + $0x328] sm:$0xff]  }
  0x33   :  { %2552 = vmatpush3.bf16.msra.mxu0 %v2747_v55  ;;  %v2806_v55 = vld [vmem:[%s3795_s1 + $0x320] sm:$0xff]  }
  0x34   :  { %2553 = vmatprep.subr.bf16.mxu0 %v2750_v58  ;;  %v2809_v58 = vld [vmem:[%s3795_s1 + $0x338] sm:$0xff]  }
  0x35   :  { %2574 = vmatpush3.bf16.msra.mxu1 %v2749_v57  ;;  %v2808_v57 = vld [vmem:[%s3795_s1 + $0x330] sm:$0xff]  }
  0x36   :  { %2575 = vmatprep.subr.bf16.mxu1 %v2752_v60 }
  0x37   :  { %2554 = vmatpush3.bf16.msra.mxu0 %v2751_v59  ;;  %v2810_v59 = vld [vmem:[%s3794_s0 + $0x30] ss:$0 sps:$4 sm:$0xff]  }
  0x38   :  { %2555 = vmatprep.subr.bf16.mxu0 %v2754_v62 }
  0x39   :  { %2576 = vmatpush3.bf16.msra.mxu1 %v2753_v61 }
  0x3a   :  { %2577 = vmatprep.subr.bf16.mxu1 %v2756_v0 }
  0x3b   :  { %2556 = vmatpush3.bf16.msra.mxu0 %v2755_v63 }
  0x3c   :  { %2557 = vmatprep.subr.bf16.mxu0 %v2758_v2 }
  0x3d   :  { %2578 = vmatpush3.bf16.msra.mxu1 %v2757_v1 }
  0x3e   :  { %2579 = vmatprep.subr.bf16.mxu1 %v2760_v4 }
  0x3f   :  { %2558 = vmatpush3.bf16.msra.mxu0 %v2759_v3 }
  0x40   :  { %2587 = vmatprep.subr.bf16.mxu0 %v2764_v9 }
  0x41   :  { %2580 = vmatpush3.bf16.msra.mxu1 %v2763_v8 }
  0x42   :  { %1030 = vmatmul.mubr.bf16.vlgmr.msra.gmra.mrb[4].mxu0 %v2282_v6  ;;  %2609 = vmatprep.subr.bf16.mxu1 %v2768_v14 }
  0x43   :  { %2588 = vmatpush3.bf16.msra.mxu0 %v2767_v13  ;;  %1109 = vmatprep.mubr.bf16.mxu0 %v2287_v45 }
  0x44   :  { %1070 = vmatmul.mubr.bf16.vlgmr.msra.gmra.mrb[4].mxu1 %v2284_v11  ;;  %2589 = vmatprep.subr.bf16.mxu0 %v2770_v16 }
  0x45   :  { %2610 = vmatpush3.bf16.msra.mxu1 %v2769_v15  ;;  %1149 = vmatprep.mubr.bf16.mxu1 %v2289_v50 }
  0x46   :  { %2611 = vmatprep.subr.bf16.mxu1 %v2772_v18 }
  0x47   :  { %2590 = vmatpush3.bf16.msra.mxu0 %v2771_v17 }
  0x48   :  { %2591 = vmatprep.subr.bf16.mxu0 %v2774_v20 }
  0x49   :  { %2612 = vmatpush3.bf16.msra.mxu1 %v2773_v19 }
  0x4a   :  { %2613 = vmatprep.subr.bf16.mxu1 %v2776_v22 }
  0x4b   :  { %2592 = vmatpush3.bf16.msra.mxu0 %v2775_v21 }
  0x4c   :  { %2593 = vmatprep.subr.bf16.mxu0 %v2778_v24 }
  0x4d   :  { %2614 = vmatpush3.bf16.msra.mxu1 %v2777_v23 }
  0x4e   :  { %2615 = vmatprep.subr.bf16.mxu1 %v2780_v26 }
  0x4f   :  { %2594 = vmatpush3.bf16.msra.mxu0 %v2779_v25 }
  0x50   :  { %2595 = vmatprep.subr.bf16.mxu0 %v2782_v28 }
  0x51   :  { %2616 = vmatpush3.bf16.msra.mxu1 %v2781_v27 }
  0x52   :  { %2617 = vmatprep.subr.bf16.mxu1 %v2784_v30 }
  0x53   :  { %2596 = vmatpush3.bf16.msra.mxu0 %v2783_v29 }
  0x54   :  { %2597 = vmatprep.subr.bf16.mxu0 %v2786_v32 }
  0x55   :  { %2618 = vmatpush3.bf16.msra.mxu1 %v2785_v31 }
  0x56   :  { %2619 = vmatprep.subr.bf16.mxu1 %v2788_v34 }
  0x57   :  { %2598 = vmatpush3.bf16.msra.mxu0 %v2787_v33 }
  0x58   :  { %2599 = vmatprep.subr.bf16.mxu0 %v2790_v36 }
  0x59   :  { %2620 = vmatpush3.bf16.msra.mxu1 %v2789_v35 }
  0x5a   :  { %2621 = vmatprep.subr.bf16.mxu1 %v2792_v38 }
  0x5b   :  { %2600 = vmatpush3.bf16.msra.mxu0 %v2791_v37 }
  0x5c   :  { %2601 = vmatprep.subr.bf16.mxu0 %v2794_v40 }
  0x5d   :  { %2622 = vmatpush3.bf16.msra.mxu1 %v2793_v39 }
  0x5e   :  { %2623 = vmatprep.subr.bf16.mxu1 %v2796_v42 }
  0x5f   :  { %2602 = vmatpush3.bf16.msra.mxu0 %v2795_v41 }
  0x60   :  { %2649 = vmatprep.subr.bf16.mxu0 %v3011_v48 }
  0x61   :  { %2624 = vmatpush3.bf16.msra.mxu1 %v2799_v46 }
  0x62   :  { %1110 = vmatmul.mubr.bf16.vlgmr.msra.gmra.mrb[8].mxu0 %v2286_v44 }
  0x63   :  { %2650 = vmatpush3.bf16.msra.mxu0 %v2802_v51  ;;  %2665 = vmatprep.mubr.msk.bf16.mxu0 %vm3012_vm0, %v3011_v48 }
  0x64   :  { %1150 = vmatmul.mubr.bf16.vlgmr.msra.gmra.mrb[8].mxu1 %v2288_v49  ;;  %2651 = vmatprep.subr.bf16.mxu0 %v3011_v48 }
  0x67   :  { %2652 = vmatpush3.bf16.msra.mxu0 %v2803_v52 }
  0x68   :  { %2653 = vmatprep.subr.bf16.mxu0 %v3011_v48 }
  0x6b   :  { %2654 = vmatpush3.bf16.msra.mxu0 %v2804_v53 }
  0x6c   :  { %2655 = vmatprep.subr.bf16.mxu0 %v3011_v48 }
  0x6f   :  { %2656 = vmatpush3.bf16.msra.mxu0 %v2805_v54 }
  0x70   :  { %2657 = vmatprep.subr.bf16.mxu0 %v3011_v48 }
  0x73   :  { %2658 = vmatpush3.bf16.msra.mxu0 %v2806_v55 }
  0x74   :  { %2659 = vmatprep.subr.bf16.mxu0 %v3011_v48 }
  0x77   :  { %2660 = vmatpush3.bf16.msra.mxu0 %v2807_v56 }
  0x78   :  { %2661 = vmatprep.subr.bf16.mxu0 %v3011_v48 }
  0x7b   :  { %2662 = vmatpush3.bf16.msra.mxu0 %v2808_v57 }
  0x7c   :  { %2663 = vmatprep.subr.bf16.mxu0 %v3011_v48 }
  0x7f   :  { %2664 = vmatpush3.bf16.msra.mxu0 %v2809_v58 }
  0x82   :  { %2666 = vmatmul.mubr.bf16.vlgmr.msra.gmra.mrb[12].mxu0 %v2810_v59 }
  0x83   :  { %13 = vsyncpa [#allocation5], 0  ;;  %v2811_v60 = vld [vmem:[%s3797_s3] ss:$52 sps:$4 sm:$0xff]   ;;  %v2813_v61 = vld [vmem:[%s3797_s3 + $0x4] ss:$52 sps:$4 sm:$0xff]  }
  0x84   :  { %v2814_v62 = vld [vmem:[%s3797_s3 + $0x8] ss:$52 sps:$4 sm:$0xff]   ;;  %v2816_v63 = vld [vmem:[%s3797_s3 + $0xc] ss:$52 sps:$4 sm:$0xff]   ;;  %1911 = vmatprep.subr.bf16.mxu1 %v2813_v61  ;;  %v2820_v3 = vld [vmem:[%s3797_s3 + $0x70] ss:$52 sps:$4 sm:$0xff]  }
  0x85   :  { %v2819_v0 = vld [vmem:[%s3797_s3 + $0x6c] ss:$52 sps:$4 sm:$0xff]   ;;  %v2822_v1 = vld [vmem:[%s3797_s3 + $0x74] ss:$52 sps:$4 sm:$0xff]   ;;  %1952 = vmatprep.subr.bf16.mxu0 %v2816_v63  ;;  %1912 = vmatpush1.bf16.msra.mxu1 %v2811_v60  ;;  %v2828_v5 = vld [vmem:[%s3797_s3 + $0xdc] ss:$52 sps:$4 sm:$0xff]  }
  0x86   :  { %v2817_v2 = vld [vmem:[%s3797_s3 + $0x68] ss:$52 sps:$4 sm:$0xff]   ;;  %1953 = vmatpush1.bf16.msra.mxu0 %v2814_v62  ;;  %1913 = vmatprep.subr.bf16.mxu1 %v2819_v0  ;;  %v2823_v6 = vld [vmem:[%s3797_s3 + $0xd0] ss:$52 sps:$4 sm:$0xff]   ;;  %v2826_v7 = vld [vmem:[%s3797_s3 + $0xd8] ss:$52 sps:$4 sm:$0xff]  }
  0x87   :  { %v2825_v4 = vld [vmem:[%s3797_s3 + $0xd4] ss:$52 sps:$4 sm:$0xff]   ;;  %1954 = vmatprep.subr.bf16.mxu0 %v2822_v1  ;;  %v2831_v8 = vld [vmem:[%s3797_s3 + $0x13c] ss:$52 sps:$4 sm:$0xff]   ;;  %v2834_v9 = vld [vmem:[%s3797_s3 + $0x144] ss:$52 sps:$4 sm:$0xff]  }
  0x88   :  { %v2829_v10 = vld [vmem:[%s3797_s3 + $0x138] ss:$52 sps:$4 sm:$0xff]   ;;  %v2832_v11 = vld [vmem:[%s3797_s3 + $0x140] ss:$52 sps:$4 sm:$0xff]   ;;  %v2838_v15 = vld [vmem:[%s3797_s3 + $0x1a8] ss:$52 sps:$4 sm:$0xff]  }
  0x89   :  { %1914 = vmatpush1.bf16.msra.mxu1 %v2817_v2  ;;  %v2837_v12 = vld [vmem:[%s3797_s3 + $0x1a4] ss:$52 sps:$4 sm:$0xff]   ;;  %v2840_v13 = vld [vmem:[%s3797_s3 + $0x1ac] ss:$52 sps:$4 sm:$0xff]   ;;  %v2846_v17 = vld [vmem:[%s3797_s3 + $0x214] ss:$52 sps:$4 sm:$0xff]  }
  0x8a   :  { %1955 = vmatpush1.bf16.msra.mxu0 %v2820_v3  ;;  %1915 = vmatprep.subr.bf16.mxu1 %v2825_v4  ;;  %v2835_v14 = vld [vmem:[%s3797_s3 + $0x1a0] ss:$52 sps:$4 sm:$0xff]   ;;  %v2841_v18 = vld [vmem:[%s3797_s3 + $0x208] ss:$52 sps:$4 sm:$0xff]   ;;  %v2844_v19 = vld [vmem:[%s3797_s3 + $0x210] ss:$52 sps:$4 sm:$0xff]  }
  0x8b   :  { %1956 = vmatprep.subr.bf16.mxu0 %v2828_v5  ;;  %v2843_v16 = vld [vmem:[%s3797_s3 + $0x20c] ss:$52 sps:$4 sm:$0xff]   ;;  %v2849_v20 = vld [vmem:[%s3797_s3 + $0x274] ss:$52 sps:$4 sm:$0xff]   ;;  %v2852_v21 = vld [vmem:[%s3797_s3 + $0x27c] ss:$52 sps:$4 sm:$0xff]  }
  0x8c   :  { %v2847_v22 = vld [vmem:[%s3797_s3 + $0x270] ss:$52 sps:$4 sm:$0xff]   ;;  %v2850_v23 = vld [vmem:[%s3797_s3 + $0x278] ss:$52 sps:$4 sm:$0xff]   ;;  %v2856_v27 = vld [vmem:[%s3797_s3 + $0x2e0] ss:$52 sps:$4 sm:$0xff]  }
  0x8d   :  { %1916 = vmatpush1.bf16.msra.mxu1 %v2823_v6  ;;  %v2855_v24 = vld [vmem:[%s3797_s3 + $0x2dc] ss:$52 sps:$4 sm:$0xff]   ;;  %v2858_v25 = vld [vmem:[%s3797_s3 + $0x2e4] ss:$52 sps:$4 sm:$0xff]   ;;  %v2861_v28 = vld [vmem:[%s3797_s3 + $0x14] ss:$52 sps:$4 sm:$0xff]  }
  0x8e   :  { %1957 = vmatpush1.bf16.msra.mxu0 %v2826_v7  ;;  %1917 = vmatprep.subr.bf16.mxu1 %v2831_v8  ;;  %v2853_v26 = vld [vmem:[%s3797_s3 + $0x2d8] ss:$52 sps:$4 sm:$0xff]   ;;  %v2864_v29 = vld [vmem:[%s3797_s3 + $0x1c] ss:$52 sps:$4 sm:$0xff]   ;;  %v3013_v30 = vmov 0   ;;  %s3014_s23 = smov [#allocation2]  }
  0x8f   :  { %1958 = vmatprep.subr.bf16.mxu0 %v2834_v9  ;;  %1943 = vmatprep.mubr.bf16.mxu1 %v3013_v30  ;;  %v2277_v32 = vld [vmem:[%s3796_s2] ss:$0 sm:$0xff]  ;;  %s2255_s24 = sshll.u32 %s3014_s23, 4  ;;  %s2256_s24 = int_to_ptr.vmem [resolvable:$true] %s2255_s24 }
  0x90   :  { %1984 = vmatprep.mubr.bf16.mxu0 %v3013_v30  ;;  %s2963_s25 = scalar_lea.vmem %s2256_s24, 128  ;;  %p2968_p1 = scmp.lt.s32.totalorder %s2256_s24, %s2256_s24 }
  0x91   :  { %1918 = vmatpush1.bf16.msra.mxu1 %v2829_v10  ;;  %p2964_p0 = scmp.ne.s32.totalorder %s2256_s24, %s2963_s25  ;;  %p2969_p2 = scmp.lt.s32.totalorder %s2963_s25, %s2963_s25 }
  0x92   :  { %1959 = vmatpush1.bf16.msra.mxu0 %v2832_v11  ;;  %1919 = vmatprep.subr.bf16.mxu1 %v2837_v12  ;;  %v2859_v12 = vld [vmem:[%s3797_s3 + $0x10] ss:$52 sps:$4 sm:$0xff]  }
  0x93   :  { %1960 = vmatprep.subr.bf16.mxu0 %v2840_v13  ;;  %v2862_v13 = vld [vmem:[%s3797_s3 + $0x18] ss:$52 sps:$4 sm:$0xff]   ;;  %p2970_p3 = por %p2969_p2, %p2968_p1 }
  0x95   :  { %1920 = vmatpush1.bf16.msra.mxu1 %v2835_v14  ;;  %p2971_p4 = pnand %p2970_p3, %p2964_p0 }
  0x96   :  { %1961 = vmatpush1.bf16.msra.mxu0 %v2838_v15  ;;  %1921 = vmatprep.subr.bf16.mxu1 %v2843_v16  ;;  %v2867_v15 = vld [vmem:[%s3797_s3 + $0x7c] ss:$52 sps:$4 sm:$0xff]   ;;  %v2870_v16 = vld [vmem:[%s3797_s3 + $0x84] ss:$52 sps:$4 sm:$0xff]  }
  0x97   :  { %1962 = vmatprep.subr.bf16.mxu0 %v2846_v17  ;;  %v2865_v17 = vld [vmem:[%s3797_s3 + $0x78] ss:$52 sps:$4 sm:$0xff]  }
  0x99   :  { %1922 = vmatpush1.bf16.msra.mxu1 %v2841_v18  ;;  %v2868_v18 = vld [vmem:[%s3797_s3 + $0x80] ss:$52 sps:$4 sm:$0xff]  }
  0x9a   :  { %1963 = vmatpush1.bf16.msra.mxu0 %v2844_v19  ;;  %1923 = vmatprep.subr.bf16.mxu1 %v2849_v20  ;;  %v2873_v19 = vld [vmem:[%s3797_s3 + $0xe4] ss:$52 sps:$4 sm:$0xff]   ;;  %v2876_v20 = vld [vmem:[%s3797_s3 + $0xec] ss:$52 sps:$4 sm:$0xff]  }
  0x9b   :  { %1964 = vmatprep.subr.bf16.mxu0 %v2852_v21  ;;  %v2871_v21 = vld [vmem:[%s3797_s3 + $0xe0] ss:$52 sps:$4 sm:$0xff]  }
  0x9d   :  { %1924 = vmatpush1.bf16.msra.mxu1 %v2847_v22  ;;  %v2874_v22 = vld [vmem:[%s3797_s3 + $0xe8] ss:$52 sps:$4 sm:$0xff]  }
  0x9e   :  { %1965 = vmatpush1.bf16.msra.mxu0 %v2850_v23  ;;  %1925 = vmatprep.subr.bf16.mxu1 %v2855_v24  ;;  %v2879_v23 = vld [vmem:[%s3797_s3 + $0x14c] ss:$52 sps:$4 sm:$0xff]   ;;  %v2882_v24 = vld [vmem:[%s3797_s3 + $0x154] ss:$52 sps:$4 sm:$0xff]  }
  0x9f   :  { %1966 = vmatprep.subr.bf16.mxu0 %v2858_v25  ;;  %v2877_v25 = vld [vmem:[%s3797_s3 + $0x148] ss:$52 sps:$4 sm:$0xff]  }
  0xa1   :  { %1926 = vmatpush1.bf16.msra.mxu1 %v2853_v26  ;;  %v2880_v26 = vld [vmem:[%s3797_s3 + $0x150] ss:$52 sps:$4 sm:$0xff]  }
  0xa2   :  { %1967 = vmatpush1.bf16.msra.mxu0 %v2856_v27  ;;  %1993 = vmatprep.subr.bf16.mxu1 %v2861_v28  ;;  %v2885_v27 = vld [vmem:[%s3797_s3 + $0x1b4] ss:$52 sps:$4 sm:$0xff]   ;;  %v2888_v28 = vld [vmem:[%s3797_s3 + $0x1bc] ss:$52 sps:$4 sm:$0xff]  }
  0xa3   :  { %2034 = vmatprep.subr.bf16.mxu0 %v2864_v29  ;;  %v2883_v29 = vld [vmem:[%s3797_s3 + $0x1b0] ss:$52 sps:$4 sm:$0xff]  }
  0xf5   :  { %v2515_v31 = vpop.f32.mrb[0].mxu0 }
  0xf6   :  { %v2516_v33 = vpop.f32.mrb[1].mxu0 }
  0xf7   :  { %v2517_v34 = vadd.f32 %v2516_v33, %v2515_v31  ;;  %v2518_v35 = vpop.f32.mrb[2].mxu0  ;;  %v2537_v36 = vpop.f32.mrb[0].mxu1  ;;  %v2886_v31 = vld [vmem:[%s3797_s3 + $0x1b8] ss:$52 sps:$4 sm:$0xff]  }
  0xf8   :  { %v2519_v37 = vpop.f32.mrb[3].mxu0  ;;  %v2538_v38 = vpop.f32.mrb[1].mxu1  ;;  %v2894_v33 = vld [vmem:[%s3797_s3 + $0x224] ss:$52 sps:$4 sm:$0xff]   ;;  %v2892_v35 = vld [vmem:[%s3797_s3 + $0x220] ss:$52 sps:$4 sm:$0xff]  }
  0xf9   :  { %v952_v39 = vadd.f32 %v2517_v34, %v2277_v32  ;;  %v2539_v40 = vadd.f32 %v2538_v38, %v2537_v36  ;;  %v2540_v41 = vpop.f32.mrb[2].mxu1  ;;  %v2891_v32 = vld [vmem:[%s3797_s3 + $0x21c] ss:$52 sps:$4 sm:$0xff]   ;;  %v2889_v34 = vld [vmem:[%s3797_s3 + $0x218] ss:$52 sps:$4 sm:$0xff]  }
  0xfa   :  { %v2541_v42 = vpop.f32.mrb[3].mxu1  ;;  %v2897_v36 = vld [vmem:[%s3797_s3 + $0x284] ss:$52 sps:$4 sm:$0xff]   ;;  %v2900_v37 = vld [vmem:[%s3797_s3 + $0x28c] ss:$52 sps:$4 sm:$0xff]  }
  0xfb   :  { %v992_v43 = vadd.f32 %v2539_v40, %v952_v39  ;;  %v2895_v38 = vld [vmem:[%s3797_s3 + $0x280] ss:$52 sps:$4 sm:$0xff]   ;;  %v2898_v39 = vld [vmem:[%s3797_s3 + $0x288] ss:$52 sps:$4 sm:$0xff]  }
  0xfc   :  { %v2903_v40 = vld [vmem:[%s3797_s3 + $0x2ec] ss:$52 sps:$4 sm:$0xff]   ;;  %v2906_v41 = vld [vmem:[%s3797_s3 + $0x2f4] ss:$52 sps:$4 sm:$0xff]  }
  0xfd   :  { %v2901_v42 = vld [vmem:[%s3797_s3 + $0x2e8] ss:$52 sps:$4 sm:$0xff]  }
 0x115   :  { %v2559_v44 = vpop.f32.mrb[4].mxu0 }
 0x116   :  { %v2560_v45 = vpop.f32.mrb[5].mxu0 }
 0x117   :  { %v2561_v46 = vadd.f32 %v2560_v45, %v2559_v44  ;;  %v2562_v47 = vpop.f32.mrb[6].mxu0  ;;  %v2581_v49 = vpop.f32.mrb[4].mxu1  ;;  %v2909_v44 = vld [vmem:[%s3797_s3 + $0x24] ss:$52 sps:$4 sm:$0xff]   ;;  %v2912_v45 = vld [vmem:[%s3797_s3 + $0x2c] ss:$52 sps:$4 sm:$0xff]  }
 0x118   :  { %v2563_v50 = vpop.f32.mrb[7].mxu0  ;;  %v2582_v52 = vpop.f32.mrb[5].mxu1  ;;  %v2910_v47 = vld [vmem:[%s3797_s3 + $0x28] ss:$52 sps:$4 sm:$0xff]  }
 0x119   :  { %v1032_v51 = vadd.f32 %v2561_v46, %v992_v43  ;;  %v2583_v53 = vadd.f32 %v2582_v52, %v2581_v49  ;;  %v2584_v54 = vpop.f32.mrb[6].mxu1  ;;  %v2904_v43 = vld [vmem:[%s3797_s3 + $0x2f0] ss:$52 sps:$4 sm:$0xff]   ;;  %v2907_v46 = vld [vmem:[%s3797_s3 + $0x20] ss:$52 sps:$4 sm:$0xff]  }
 0x11a   :  { %v2585_v55 = vpop.f32.mrb[7].mxu1  ;;  %v2915_v49 = vld [vmem:[%s3797_s3 + $0x8c] ss:$52 sps:$4 sm:$0xff]   ;;  %v2918_v50 = vld [vmem:[%s3797_s3 + $0x94] ss:$52 sps:$4 sm:$0xff]  }
 0x11b   :  { %v1072_v56 = vadd.f32 %v2583_v53, %v1032_v51  ;;  %v2913_v51 = vld [vmem:[%s3797_s3 + $0x88] ss:$52 sps:$4 sm:$0xff]   ;;  %v2916_v52 = vld [vmem:[%s3797_s3 + $0x90] ss:$52 sps:$4 sm:$0xff]  }
 0x11c   :  { %v2921_v53 = vld [vmem:[%s3797_s3 + $0xf4] ss:$52 sps:$4 sm:$0xff]   ;;  %v2924_v54 = vld [vmem:[%s3797_s3 + $0xfc] ss:$52 sps:$4 sm:$0xff]  }
 0x11d   :  { %v2919_v55 = vld [vmem:[%s3797_s3 + $0xf0] ss:$52 sps:$4 sm:$0xff]  }
 0x135   :  { %v2603_v57 = vpop.f32.mrb[8].mxu0 }
 0x136   :  { %v2604_v58 = vpop.f32.mrb[9].mxu0 }
 0x137   :  { %v2605_v59 = vadd.f32 %v2604_v58, %v2603_v57  ;;  %v2606_v60 = vpop.f32.mrb[10].mxu0  ;;  %v2625_v61 = vpop.f32.mrb[8].mxu1  ;;  %v2927_v57 = vld [vmem:[%s3797_s3 + $0x15c] ss:$52 sps:$4 sm:$0xff]   ;;  %v2925_v58 = vld [vmem:[%s3797_s3 + $0x158] ss:$52 sps:$4 sm:$0xff]  }
 0x138   :  { %v2607_v62 = vpop.f32.mrb[11].mxu0  ;;  %v2626_v63 = vpop.f32.mrb[9].mxu1  ;;  %v2933_v60 = vld [vmem:[%s3797_s3 + $0x1c4] ss:$52 sps:$4 sm:$0xff]  }
 0x139   :  { %v1112_v0 = vadd.f32 %v2605_v59, %v1072_v56  ;;  %v2627_v1 = vadd.f32 %v2626_v63, %v2625_v61  ;;  %v2628_v2 = vpop.f32.mrb[10].mxu1  ;;  %v2922_v56 = vld [vmem:[%s3797_s3 + $0xf8] ss:$52 sps:$4 sm:$0xff]   ;;  %v2928_v59 = vld [vmem:[%s3797_s3 + $0x160] ss:$52 sps:$4 sm:$0xff]  }
 0x13a   :  { %v2629_v3 = vpop.f32.mrb[11].mxu1  ;;  %v2936_v61 = vld [vmem:[%s3797_s3 + $0x1cc] ss:$52 sps:$4 sm:$0xff]   ;;  %v2934_v63 = vld [vmem:[%s3797_s3 + $0x1c8] ss:$52 sps:$4 sm:$0xff]  }
 0x13b   :  { %v1152_v4 = vadd.f32 %v2627_v1, %v1112_v0  ;;  %v2931_v62 = vld [vmem:[%s3797_s3 + $0x1c0] ss:$52 sps:$4 sm:$0xff]   ;;  %v2937_v2 = vld [vmem:[%s3797_s3 + $0x228] ss:$52 sps:$4 sm:$0xff]   ;;  %v2940_v3 = vld [vmem:[%s3797_s3 + $0x230] ss:$52 sps:$4 sm:$0xff]  }
 0x13c   :  { %v2939_v0 = vld [vmem:[%s3797_s3 + $0x22c] ss:$52 sps:$4 sm:$0xff]   ;;  %v2942_v1 = vld [vmem:[%s3797_s3 + $0x234] ss:$52 sps:$4 sm:$0xff]  }
 0x155   :  { %v1191_v5 = vpop.f32.mrb[12].mxu0 }
 0x156   :  { %v1192_v6 = vadd.f32 %v1191_v5, %v1152_v4  ;;  %v2667_v7 = vpop.f32.mrb[13].mxu0  ;;  %v2945_v4 = vld [vmem:[%s3797_s3 + $0x294] ss:$52 sps:$4 sm:$0xff]   ;;  %v2948_v5 = vld [vmem:[%s3797_s3 + $0x29c] ss:$52 sps:$4 sm:$0xff]  }
 0x157   :  { %v1194_v8 = vpop.f32.mrb[14].mxu0  ;;  %v2946_v7 = vld [vmem:[%s3797_s3 + $0x298] ss:$52 sps:$4 sm:$0xff]  }
 0x158   :  { %vm1197_vm1 = vcmp.gt.f32.partialorder %v1192_v6, 0.0  ;;  %v1198_v9 = vmul.f32 0.2, %v1192_v6  ;;  %v2668_v10 = vpop.f32.mrb[15].mxu0  ;;  %v2951_v8 = vld [vmem:[%s3797_s3 + $0x2fc] ss:$52 sps:$4 sm:$0xff]  }
 0x159   :  { %v2949_v10 = vld [vmem:[%s3797_s3 + $0x2f8] ss:$52 sps:$4 sm:$0xff]  }
 0x15a   :  { %v1199_v11 = vsel %vm1197_vm1, %v1192_v6, %v1198_v9  ;;  %v2943_v6 = vld [vmem:[%s3797_s3 + $0x290] ss:$52 sps:$4 sm:$0xff]  }
 0x15b   :  { %v3507_v14 = vpack.c.bf16 %v1199_v11, %v1199_v11  ;;  %1200 = vst [vmem:[#allocation2] sm:$0xff] %v1199_v11  ;;  %v2954_v9 = vld [vmem:[%s3797_s3 + $0x304] ss:$52 sps:$4 sm:$0xff]   ;;  %v2952_v11 = vld [vmem:[%s3797_s3 + $0x300] ss:$52 sps:$4 sm:$0xff]  }
 0x15d   :  { %1944 = vmatmul.mubr.bf16.vlgmr.msra.gmra.mrb[12].mxu1 %v3507_v14  ;;  %1985 = vmatmul.mubr.bf16.vlgmr.msra.gmra.mrb[16].mxu0 %v3507_v14 }
 0x15e   :  { %1994 = vmatpush1.bf16.msra.mxu1 %v2859_v12  ;;  %2035 = vmatpush1.bf16.msra.mxu0 %v2862_v13  ;;  %v2955_v12 = vld [vmem:[%s3797_s3 + $0x30] ss:$52 sps:$4 sm:$0xff]   ;;  %v2956_v13 = vld [vmem:[%s3797_s3 + $0x98] ss:$52 sps:$4 sm:$0xff]  }
 0x15f   :  { %1995 = vmatprep.subr.bf16.mxu1 %v2867_v15  ;;  %2036 = vmatprep.subr.bf16.mxu0 %v2870_v16  ;;  %v2957_v15 = vld [vmem:[%s3797_s3 + $0x100] ss:$52 sps:$4 sm:$0xff]   ;;  %v2958_v16 = vld [vmem:[%s3797_s3 + $0x168] ss:$52 sps:$4 sm:$0xff]  }
 0x160   :  { %2025 = vmatprep.mubr.bf16.mxu1 %v3013_v30  ;;  %2066 = vmatprep.mubr.bf16.mxu0 %v3013_v30 }
 0x162   :  { %1996 = vmatpush1.bf16.msra.mxu1 %v2865_v17  ;;  %2037 = vmatpush1.bf16.msra.mxu0 %v2868_v18  ;;  %v2959_v17 = vld [vmem:[%s3797_s3 + $0x1d0] ss:$52 sps:$4 sm:$0xff]   ;;  %v2960_v18 = vld [vmem:[%s3797_s3 + $0x238] ss:$52 sps:$4 sm:$0xff]  }
 0x163   :  { %1997 = vmatprep.subr.bf16.mxu1 %v2873_v19  ;;  %2038 = vmatprep.subr.bf16.mxu0 %v2876_v20  ;;  %v2961_v19 = vld [vmem:[%s3797_s3 + $0x2a0] ss:$52 sps:$4 sm:$0xff]   ;;  %v2962_v20 = vld [vmem:[%s3797_s3 + $0x308] ss:$52 sps:$4 sm:$0xff]  }
 0x166   :  { %1998 = vmatpush1.bf16.msra.mxu1 %v2871_v21  ;;  %2039 = vmatpush1.bf16.msra.mxu0 %v2874_v22 }
 0x167   :  { %1999 = vmatprep.subr.bf16.mxu1 %v2879_v23  ;;  %2040 = vmatprep.subr.bf16.mxu0 %v2882_v24 }
 0x16a   :  { %2000 = vmatpush1.bf16.msra.mxu1 %v2877_v25  ;;  %2041 = vmatpush1.bf16.msra.mxu0 %v2880_v26 }
 0x16b   :  { %2001 = vmatprep.subr.bf16.mxu1 %v2885_v27  ;;  %2042 = vmatprep.subr.bf16.mxu0 %v2888_v28 }
 0x16e   :  { %2002 = vmatpush1.bf16.msra.mxu1 %v2883_v29  ;;  %2043 = vmatpush1.bf16.msra.mxu0 %v2886_v31 }
 0x16f   :  { %2003 = vmatprep.subr.bf16.mxu1 %v2891_v32  ;;  %2044 = vmatprep.subr.bf16.mxu0 %v2894_v33 }
 0x172   :  { %2004 = vmatpush1.bf16.msra.mxu1 %v2889_v34  ;;  %2045 = vmatpush1.bf16.msra.mxu0 %v2892_v35 }
 0x173   :  { %2005 = vmatprep.subr.bf16.mxu1 %v2897_v36  ;;  %2046 = vmatprep.subr.bf16.mxu0 %v2900_v37 }
 0x176   :  { %2006 = vmatpush1.bf16.msra.mxu1 %v2895_v38  ;;  %2047 = vmatpush1.bf16.msra.mxu0 %v2898_v39 }
 0x177   :  { %2007 = vmatprep.subr.bf16.mxu1 %v2903_v40  ;;  %2048 = vmatprep.subr.bf16.mxu0 %v2906_v41 }
 0x17a   :  { %2008 = vmatpush1.bf16.msra.mxu1 %v2901_v42  ;;  %2049 = vmatpush1.bf16.msra.mxu0 %v2904_v43 }
 0x17b   :  { %2075 = vmatprep.subr.bf16.mxu1 %v2909_v44  ;;  %2116 = vmatprep.subr.bf16.mxu0 %v2912_v45 }
 0x17d   :  { %2026 = vmatmul.mubr.bf16.vlgmr.msra.gmra.mrb[16].mxu1 %v3507_v14  ;;  %2067 = vmatmul.mubr.bf16.vlgmr.msra.gmra.mrb[20].mxu0 %v3507_v14 }
 0x17e   :  { %2076 = vmatpush1.bf16.msra.mxu1 %v2907_v46  ;;  %2117 = vmatpush1.bf16.msra.mxu0 %v2910_v47 }
 0x17f   :  { %2077 = vmatprep.subr.bf16.mxu1 %v2915_v49  ;;  %2118 = vmatprep.subr.bf16.mxu0 %v2918_v50 }
 0x180   :  { %2107 = vmatprep.mubr.bf16.mxu1 %v3013_v30  ;;  %2148 = vmatprep.mubr.bf16.mxu0 %v3013_v30  ;;  %v2930_v30 = vld [vmem:[%s3797_s3 + $0x164] ss:$52 sps:$4 sm:$0xff]  }
 0x182   :  { %2078 = vmatpush1.bf16.msra.mxu1 %v2913_v51  ;;  %2119 = vmatpush1.bf16.msra.mxu0 %v2916_v52 }
 0x183   :  { %2079 = vmatprep.subr.bf16.mxu1 %v2921_v53  ;;  %2120 = vmatprep.subr.bf16.mxu0 %v2924_v54 }
 0x186   :  { %2080 = vmatpush1.bf16.msra.mxu1 %v2919_v55  ;;  %2121 = vmatpush1.bf16.msra.mxu0 %v2922_v56 }
 0x187   :  { %2081 = vmatprep.subr.bf16.mxu1 %v2927_v57  ;;  %2122 = vmatprep.subr.bf16.mxu0 %v2930_v30 }
 0x18a   :  { %2082 = vmatpush1.bf16.msra.mxu1 %v2925_v58  ;;  %2123 = vmatpush1.bf16.msra.mxu0 %v2928_v59 }
 0x18b   :  { %2083 = vmatprep.subr.bf16.mxu1 %v2933_v60  ;;  %2124 = vmatprep.subr.bf16.mxu0 %v2936_v61 }
 0x18e   :  { %2084 = vmatpush1.bf16.msra.mxu1 %v2931_v62  ;;  %2125 = vmatpush1.bf16.msra.mxu0 %v2934_v63 }
 0x18f   :  { %2085 = vmatprep.subr.bf16.mxu1 %v2939_v0  ;;  %2126 = vmatprep.subr.bf16.mxu0 %v2942_v1 }
 0x192   :  { %2086 = vmatpush1.bf16.msra.mxu1 %v2937_v2  ;;  %2127 = vmatpush1.bf16.msra.mxu0 %v2940_v3 }
 0x193   :  { %2087 = vmatprep.subr.bf16.mxu1 %v2945_v4  ;;  %2128 = vmatprep.subr.bf16.mxu0 %v2948_v5 }
 0x196   :  { %2088 = vmatpush1.bf16.msra.mxu1 %v2943_v6  ;;  %2129 = vmatpush1.bf16.msra.mxu0 %v2946_v7 }
 0x197   :  { %2089 = vmatprep.subr.bf16.mxu1 %v2951_v8  ;;  %2130 = vmatprep.subr.bf16.mxu0 %v2954_v9 }
 0x19a   :  { %2090 = vmatpush1.bf16.msra.mxu1 %v2949_v10  ;;  %2131 = vmatpush1.bf16.msra.mxu0 %v2952_v11 }
 0x19b   :  { %2669 = vmatprep.subr.bf16.mxu1 %v3011_v48 }
 0x19d   :  { %2108 = vmatmul.mubr.bf16.vlgmr.msra.gmra.mrb[20].mxu1 %v3507_v14  ;;  %2149 = vmatmul.mubr.bf16.vlgmr.msra.gmra.mrb[24].mxu0 %v3507_v14 }
 0x19e   :  { %2670 = vmatpush3.bf16.msra.mxu1 %v2955_v12  ;;  %2685 = vmatprep.mubr.msk.bf16.mxu1 %vm3012_vm0, %v3011_v48 }
 0x19f   :  { %2671 = vmatprep.subr.bf16.mxu1 %v3011_v48 }
 0x1a2   :  { %2672 = vmatpush3.bf16.msra.mxu1 %v2956_v13 }
 0x1a3   :  { %2673 = vmatprep.subr.bf16.mxu1 %v3011_v48 }
 0x1a6   :  { %2674 = vmatpush3.bf16.msra.mxu1 %v2957_v15 }
 0x1a7   :  { %2675 = vmatprep.subr.bf16.mxu1 %v3011_v48 }
 0x1aa   :  { %2676 = vmatpush3.bf16.msra.mxu1 %v2958_v16 }
 0x1ab   :  { %2677 = vmatprep.subr.bf16.mxu1 %v3011_v48 }
 0x1ae   :  { %2678 = vmatpush3.bf16.msra.mxu1 %v2959_v17 }
 0x1af   :  { %2679 = vmatprep.subr.bf16.mxu1 %v3011_v48 }
 0x1b2   :  { %2680 = vmatpush3.bf16.msra.mxu1 %v2960_v18 }
 0x1b3   :  { %2681 = vmatprep.subr.bf16.mxu1 %v3011_v48 }
 0x1b6   :  { %2682 = vmatpush3.bf16.msra.mxu1 %v2961_v19 }
 0x1b7   :  { %2683 = vmatprep.subr.bf16.mxu1 %v3011_v48 }
 0x1ba   :  { %2684 = vmatpush3.bf16.msra.mxu1 %v2962_v20 }
 0x1bd   :  { %2686 = vmatmul.mubr.bf16.vlgmr.msra.gmra.mrb[24].mxu1 %v3507_v14 }
 0x1be   :  { %2974 = shalt.err (!%p2971_p4)
}
 0x1bf   :  { %s2975_s28 = scalar_lea.hbm %s3799_s5, 128 }
 0x1c0   :  { %p2976_p5 = scmp.ne.s32.totalorder %s3799_s5, %s2975_s28  ;;  %p2979_p6 = scmp.lt.u32.totalorder %s2975_s28, %s3799_s5 }
 0x1c2   :  { %p2981_p7 = pnand %p2979_p6, %p2976_p5 }
 0x1c4   :  { %2984 = shalt.err (!%p2981_p7)
}
 0x1c5   :  { %2258 = dma.vmem_to_hbm [thread:$0]  %s2256_s24, 128, %s3799_s5, [#allocation3]   ;;  %v1318_v48 = vlaneseq  ;;  %v1314_v23 = vld [vmem:[%s3798_s4] sm:$0xff]  ;;  %v1315_v16 = vld [vmem:[%s3798_s4 + $0x8] sm:$0x1f] }
 0x1c6   :  { %s3015_s4 = smov [#allocation4]  }
 0x1c7   :  { %v3746_v14 = vshrl.u32 %v1318_v48, 7  ;;  %s2265_s11 = sshll.u32 %s3015_s4, 4  ;;  %s2266_s11 = int_to_ptr.vmem [resolvable:$true] %s2265_s11 }
 0x1c8   :  { %s2985_s12 = scalar_lea.vmem %s2266_s11, 1664  ;;  %p2990_p9 = scmp.lt.s32.totalorder %s2266_s11, %s2266_s11 }
 0x1c9   :  { %v1320_v21 = vsub.s32 0, %v3746_v14  ;;  %v1328_v22 = vsub.s32 2, %v3746_v14  ;;  %v1324_v24 = vsub.s32 1, %v3746_v14  ;;  %v1332_v25 = vsub.s32 3, %v3746_v14  ;;  %p2986_p8 = scmp.ne.s32.totalorder %s2266_s11, %s2985_s12  ;;  %p2991_p10 = scmp.lt.s32.totalorder %s2985_s12, %s2985_s12 }
 0x1ca   :  { %v1336_v52 = vsub.s32 4, %v3746_v14  ;;  %v1344_v53 = vsub.s32 6, %v3746_v14  ;;  %v1340_v54 = vsub.s32 5, %v3746_v14  ;;  %v1348_v55 = vsub.s32 7, %v3746_v14 }
 0x1cb   :  { %v1321_v26 = vrot.slane %v1314_v23, %v1320_v21  ;;  %v1329_v27 = vrot.slane %v1314_v23, %v1328_v22  ;;  %v1325_v28 = vrot.slane %v1314_v23, %v1324_v24  ;;  %v1333_v29 = vrot.slane %v1314_v23, %v1332_v25  ;;  %p2992_p11 = por %p2991_p10, %p2990_p9 }
 0x1cc   :  { %v1337_v56 = vrot.slane %v1314_v23, %v1336_v52  ;;  %v1345_v57 = vrot.slane %v1314_v23, %v1344_v53  ;;  %v1341_v30 = vrot.slane %v1314_v23, %v1340_v54  ;;  %v1349_v58 = vrot.slane %v1314_v23, %v1348_v55 }
 0x1cd   :  { %v1353_v17 = vrot.slane %v1315_v16, %v1320_v21  ;;  %v1361_v18 = vrot.slane %v1315_v16, %v1328_v22  ;;  %v1357_v19 = vrot.slane %v1315_v16, %v1324_v24  ;;  %v1365_v20 = vrot.slane %v1315_v16, %v1332_v25  ;;  %p2993_p12 = pnand %p2992_p11, %p2986_p8 }
 0x230   :  { %v1945_v31 = vpop.f32.mrb[12].mxu1  ;;  %v1986_v32 = vpop.f32.mrb[16].mxu0 }
 0x231   :  { %v1946_v33 = vadd.f32 %v1945_v31, %v1321_v26  ;;  %v1987_v34 = vadd.f32 %v1986_v32, %v1329_v27  ;;  %v1947_v35 = vpop.f32.mrb[13].mxu1  ;;  %v1988_v36 = vpop.f32.mrb[17].mxu0 }
 0x232   :  { %v1948_v37 = vadd.f32 %v1947_v35, %v1325_v28  ;;  %v1989_v38 = vadd.f32 %v1988_v36, %v1333_v29  ;;  %v1949_v39 = vpop.f32.mrb[14].mxu1  ;;  %v1990_v40 = vpop.f32.mrb[18].mxu0 }
 0x233   :  { %vm2197_vm2 = vcmp.gt.f32.partialorder %v1946_v33, 0.0  ;;  %v2210_v41 = vmul.f32 0.2, %v1946_v33  ;;  %vm2199_vm3 = vcmp.gt.f32.partialorder %v1987_v34, 0.0  ;;  %v2212_v42 = vmul.f32 0.2, %v1987_v34 }
 0x234   :  { %vm2198_vm4 = vcmp.gt.f32.partialorder %v1948_v37, 0.0  ;;  %v2211_v43 = vmul.f32 0.2, %v1948_v37  ;;  %vm2200_vm5 = vcmp.gt.f32.partialorder %v1989_v38, 0.0  ;;  %v2213_v44 = vmul.f32 0.2, %v1989_v38 }
 0x235   :  { %v2223_v45 = vsel %vm2197_vm2, %v1946_v33, %v2210_v41  ;;  %v2225_v46 = vsel %vm2199_vm3, %v1987_v34, %v2212_v42  ;;  %v1950_v47 = vpop.f32.mrb[15].mxu1  ;;  %v1991_v49 = vpop.f32.mrb[19].mxu0  ;;  %v1369_v41 = vrot.slane %v1315_v16, %v1336_v52 }
 0x236   :  { %2236 = vst [vmem:[#allocation4] sm:$0xff] %v2223_v45  ;;  %2238 = vst [vmem:[#allocation4 + $0x10] sm:$0xff] %v2225_v46  ;;  %v2224_v50 = vsel %vm2198_vm4, %v1948_v37, %v2211_v43  ;;  %v2226_v51 = vsel %vm2200_vm5, %v1989_v38, %v2213_v44 }
 0x237   :  { %2237 = vst [vmem:[#allocation4 + $0x8] sm:$0xff] %v2224_v50  ;;  %2239 = vst [vmem:[#allocation4 + $0x18] sm:$0xff] %v2226_v51 }
 0x250   :  { %v2027_v59 = vpop.f32.mrb[16].mxu1  ;;  %v2068_v60 = vpop.f32.mrb[20].mxu0 }
 0x251   :  { %v2028_v61 = vadd.f32 %v2027_v59, %v1337_v56  ;;  %v2069_v62 = vadd.f32 %v2068_v60, %v1345_v57  ;;  %v2029_v63 = vpop.f32.mrb[17].mxu1  ;;  %v2070_v0 = vpop.f32.mrb[21].mxu0 }
 0x252   :  { %v2030_v1 = vadd.f32 %v2029_v63, %v1341_v30  ;;  %v2071_v2 = vadd.f32 %v2070_v0, %v1349_v58  ;;  %v2031_v3 = vpop.f32.mrb[18].mxu1  ;;  %v2072_v4 = vpop.f32.mrb[22].mxu0 }
 0x253   :  { %vm2201_vm6 = vcmp.gt.f32.partialorder %v2028_v61, 0.0  ;;  %v2214_v5 = vmul.f32 0.2, %v2028_v61  ;;  %vm2203_vm7 = vcmp.gt.f32.partialorder %v2069_v62, 0.0  ;;  %v2216_v6 = vmul.f32 0.2, %v2069_v62 }
 0x254   :  { %vm2202_vm8 = vcmp.gt.f32.partialorder %v2030_v1, 0.0  ;;  %v2215_v7 = vmul.f32 0.2, %v2030_v1  ;;  %vm2204_vm9 = vcmp.gt.f32.partialorder %v2071_v2, 0.0  ;;  %v2217_v8 = vmul.f32 0.2, %v2071_v2 }
 0x255   :  { %v2227_v9 = vsel %vm2201_vm6, %v2028_v61, %v2214_v5  ;;  %v2229_v10 = vsel %vm2203_vm7, %v2069_v62, %v2216_v6  ;;  %v2032_v11 = vpop.f32.mrb[19].mxu1  ;;  %v2073_v12 = vpop.f32.mrb[23].mxu0 }
 0x256   :  { %2240 = vst [vmem:[#allocation4 + $0x20] sm:$0xff] %v2227_v9  ;;  %2242 = vst [vmem:[#allocation4 + $0x30] sm:$0xff] %v2229_v10  ;;  %v2228_v13 = vsel %vm2202_vm8, %v2030_v1, %v2215_v7  ;;  %v2230_v15 = vsel %vm2204_vm9, %v2071_v2, %v2217_v8 }
 0x257   :  { %2241 = vst [vmem:[#allocation4 + $0x28] sm:$0xff] %v2228_v13  ;;  %2243 = vst [vmem:[#allocation4 + $0x38] sm:$0xff] %v2230_v15 }
 0x270   :  { %v2109_v48 = vpop.f32.mrb[20].mxu1  ;;  %v2150_v23 = vpop.f32.mrb[24].mxu0 }
 0x271   :  { %v2110_v26 = vadd.f32 %v2109_v48, %v1353_v17  ;;  %v2151_v27 = vadd.f32 %v2150_v23, %v1361_v18  ;;  %v2111_v28 = vpop.f32.mrb[21].mxu1  ;;  %v2152_v29 = vpop.f32.mrb[25].mxu0 }
 0x272   :  { %v2112_v31 = vadd.f32 %v2111_v28, %v1357_v19  ;;  %v2153_v32 = vadd.f32 %v2152_v29, %v1365_v20  ;;  %v2113_v33 = vpop.f32.mrb[22].mxu1  ;;  %v2154_v34 = vpop.f32.mrb[26].mxu0 }
 0x273   :  { %vm2205_vm10 = vcmp.gt.f32.partialorder %v2110_v26, 0.0  ;;  %v2218_v21 = vmul.f32 0.2, %v2110_v26  ;;  %vm2207_vm11 = vcmp.gt.f32.partialorder %v2151_v27, 0.0  ;;  %v2220_v22 = vmul.f32 0.2, %v2151_v27 }
 0x274   :  { %vm2206_vm12 = vcmp.gt.f32.partialorder %v2112_v31, 0.0  ;;  %v2219_v35 = vmul.f32 0.2, %v2112_v31  ;;  %vm2208_vm13 = vcmp.gt.f32.partialorder %v2153_v32, 0.0  ;;  %v2221_v24 = vmul.f32 0.2, %v2153_v32 }
 0x275   :  { %v2231_v36 = vsel %vm2205_vm10, %v2110_v26, %v2218_v21  ;;  %v2233_v25 = vsel %vm2207_vm11, %v2151_v27, %v2220_v22  ;;  %v2114_v37 = vpop.f32.mrb[23].mxu1  ;;  %v2155_v38 = vpop.f32.mrb[27].mxu0 }
 0x276   :  { %2244 = vst [vmem:[#allocation4 + $0x40] sm:$0xff] %v2231_v36  ;;  %2246 = vst [vmem:[#allocation4 + $0x50] sm:$0xff] %v2233_v25  ;;  %v2232_v39 = vsel %vm2206_vm12, %v2112_v31, %v2219_v35  ;;  %v2234_v40 = vsel %vm2208_vm13, %v2153_v32, %v2221_v24 }
 0x277   :  { %2245 = vst [vmem:[#allocation4 + $0x48] sm:$0xff] %v2232_v39  ;;  %2247 = vst [vmem:[#allocation4 + $0x58] sm:$0xff] %v2234_v40 }
 0x290   :  { %v2191_v42 = vpop.f32.mrb[24].mxu1 }
 0x291   :  { %v2192_v43 = vadd.f32 %v2191_v42, %v1369_v41  ;;  %v2687_v44 = vpop.f32.mrb[25].mxu1 }
 0x292   :  { %v2194_v45 = vpop.f32.mrb[26].mxu1 }
 0x293   :  { %vm2209_vm14 = vcmp.gt.f32.partialorder %v2192_v43, 0.0  ;;  %v2222_v46 = vmul.f32 0.2, %v2192_v43  ;;  %v2688_v47 = vpop.f32.mrb[27].mxu1 }
 0x295   :  { %v2235_v49 = vsel %vm2209_vm14, %v2192_v43, %v2222_v46 }
 0x296   :  { %2248 = vst [vmem:[#allocation4 + $0x60] sm:$0xff] %v2235_v49 }
 0x297   :  { %2996 = shalt.err (!%p2993_p12)
}
 0x298   :  { %s2997_s15 = scalar_lea.hbm %s3800_s6, 1664 }
 0x299   :  { %p2998_p13 = scmp.ne.s32.totalorder %s3800_s6, %s2997_s15  ;;  %p3001_p0 = scmp.lt.u32.totalorder %s2997_s15, %s3800_s6 }
 0x29b   :  { %p3003_p1 = pnand %p3001_p0, %p2998_p13 }
 0x29d   :  { %3006 = shalt.err (!%p3003_p1)
}
 0x29e   :  { %2268 = dma.vmem_to_hbm [thread:$0]  %s2266_s11, 1664, %s3800_s6, [#allocation5]  }
 0x29f   :  { %3007 = dma.done.wait [#allocation3], 128  }
 0x2a0   :  { %3008 = vsyncadd [#allocation3], 4294967168 }
 0x2a1   :  { %3009 = dma.done.wait [#allocation5], 1664  }
 0x2a2   :  { %3010 = vsyncadd [#allocation5], 4294965632 }
 0x2a3   :  { %2275 = vsyncpa [#allocation3], 1 }
 0x2a4   :  { %2276 = vsyncpa [#allocation5], 1 }

</bundles_post_ra>
